<compile_context>
chip_gen: v5e
topology: v5e:2x2
jax: 0.10.0
libtpu: 0.0.40
codegen_flags: <defaults>
</compile_context>

<pallas_src>
import functools

import jax
import jax.numpy as jnp
from jax.experimental import pallas as pl
from jax.experimental.pallas import tpu as pltpu


def _ae_kernel(x_ref,
               w1_ref, b1_ref,   # encoder: input_dim -> 128
               w2_ref, b2_ref,   # encoder: 128 -> latent_dim
               w3_ref, b3_ref,   # decoder: latent_dim -> 128
               w4_ref, b4_ref,   # decoder: 128 -> input_dim
               z_ref, xhat_ref):
    w_dtype = w1_ref.dtype                      # bf16 by default (MXU-rate matmuls)
    x = x_ref[...].astype(w_dtype)

    # Encoder: Linear -> ReLU -> Linear  (MXU matmuls accumulate in f32)
    h1 = jnp.dot(x, w1_ref[...], preferred_element_type=jnp.float32)
    h1 = jnp.maximum(h1 + b1_ref[...].astype(jnp.float32), 0.0)   # f32 VPU
    z = jnp.dot(h1.astype(w_dtype), w2_ref[...],
                preferred_element_type=jnp.float32) + b2_ref[...].astype(jnp.float32)
    z_ref[...] = z.astype(z_ref.dtype)

    # Decoder: Linear -> ReLU -> Linear
    h2 = jnp.dot(z.astype(w_dtype), w3_ref[...],
                 preferred_element_type=jnp.float32)
    h2 = jnp.maximum(h2 + b3_ref[...].astype(jnp.float32), 0.0)
    xhat = jnp.dot(h2.astype(w_dtype), w4_ref[...],
                   preferred_element_type=jnp.float32) + b4_ref[...].astype(jnp.float32)
    xhat_ref[...] = xhat.astype(xhat_ref.dtype)


def _round_up(v, m):
    return ((v + m - 1) // m) * m


def _vmem_capacity_bytes():
    """Per-TensorCore VMEM capacity; conservative 64 MiB (v7x) fallback."""
    try:
        return int(pltpu.get_tpu_info().vmem_capacity_bytes)
    except Exception:
        return 64 * 1024 * 1024


def _pick_batch_tile(b_rows, per_row_bytes, tile_budget_bytes):
    """Largest batch tile whose double-buffered activation tiles fit VMEM.

    Multiple of 8 sublanes; rounded to 256-row MXU blocks when large; capped
    at 4096 rows and at <= half the (padded) batch so v7x megacore sees >= 2
    grid steps whenever the batch is big enough.
    """
    rows_needed = _round_up(max(int(b_rows), 1), 8)
    tb = max(8, int(tile_budget_bytes) // max(int(per_row_bytes), 1))
    tb = min(tb, 4096, rows_needed)
    if rows_needed >= 16:                                   # keep >= 2 grid steps
        tb = min(tb, _round_up(pl.cdiv(rows_needed, 2), 8))
    if tb >= 256:
        tb = (tb // 256) * 256                              # MXU-friendly blocks
    else:
        tb = max(8, (tb // 8) * 8)                          # sublane alignment
    return tb


@functools.partial(jax.jit, static_argnames=("out_dtype",))
def simple_ae_forward(x, params, out_dtype=None):
    """x: (B, T, D). Returns (z, x_hat) matching PyTorch SimpleAE.forward.

    out_dtype=jnp.bfloat16 halves the z/x_hat writeback traffic (this kernel is
    HBM-bound); default keeps x.dtype to preserve the module's semantics.
    """
    B, T, D = x.shape
    input_dim = T * D
    x_flat = x.reshape(B, input_dim)

    if out_dtype is None:
        out_dtype = x.dtype
    out_dtype = jnp.dtype(out_dtype)

    w1, b1, w2, b2, w3, b3, w4, b4 = params
    hidden = w1.shape[1]
    latent_dim = w2.shape[1]

    act_itemsize = x_flat.dtype.itemsize
    out_itemsize = out_dtype.itemsize
    w_itemsize = jnp.dtype(w1.dtype).itemsize
    weight_bytes = sum(int(a.size) * jnp.dtype(a.dtype).itemsize
                       for a in (w1, b1, w2, b2, w3, b3, w4, b4))

    # --- per-generation VMEM budget -> batch tile size ----------------------
    vmem_cap = _vmem_capacity_bytes()
    vmem_limit = min(int(0.75 * vmem_cap), vmem_cap - (4 << 20))
    # Streamed tiles are double-buffered by the Pallas pipeline; resident
    # weights are single-buffered (pl.Buffered(1)).
    stream_row = 2 * (input_dim * act_itemsize        # x tile in
                      + latent_dim * out_itemsize     # z tile out
                      + input_dim * out_itemsize)     # x_hat tile out
    scratch_row = (4 * (2 * hidden + latent_dim + input_dim)               # f32 h1,h2,z,xhat
                   + w_itemsize * (input_dim + 2 * hidden + latent_dim))   # bf16 casts
    per_row = stream_row + scratch_row
    tile_budget = max(int(0.85 * vmem_limit) - weight_bytes - (2 << 20),
                      8 * per_row)
    TB = _pick_batch_tile(B, per_row, tile_budget)

    # --- batch padding / grid ------------------------------------------------
    B_pad = pl.cdiv(B, TB) * TB
    if B_pad != B:
        x_flat = jnp.pad(x_flat, ((0, B_pad - B), (0, 0)))
    n_tiles = B_pad // TB

    # Activation tiles stride along the batch; weights keep the same block
    # index every step (single up-front DMA, single VMEM buffer).
    act_spec = lambda cols: pl.BlockSpec((TB, cols), lambda i: (i, 0))
    resident = lambda arr: pl.BlockSpec(arr.shape, lambda i: (0, 0),
                                        pipeline_mode=pl.Buffered(1))

    # --- advisory cost estimate ---------------------------------------------
    flops = 2 * B_pad * (input_dim * hidden + hidden * latent_dim
                         + latent_dim * hidden + hidden * input_dim)
    bytes_accessed = (x_flat.size * act_itemsize
                      + B_pad * latent_dim * out_itemsize
                      + B_pad * input_dim * out_itemsize
                      + weight_bytes)
    cost = pl.CostEstimate(flops=flops, transcendentals=0,
                           bytes_accessed=bytes_accessed)

    z_pad, xhat_pad = pl.pallas_call(
        _ae_kernel,
        out_shape=(
            jax.ShapeDtypeStruct((B_pad, latent_dim), out_dtype),
            jax.ShapeDtypeStruct((B_pad, input_dim), out_dtype),
        ),
        grid=(n_tiles,),
        in_specs=[
            act_spec(input_dim),
            resident(w1), resident(b1),
            resident(w2), resident(b2),
            resident(w3), resident(b3),
            resident(w4), resident(b4),
        ],
        out_specs=(
            act_spec(latent_dim),
            act_spec(input_dim),
        ),
        compiler_params=pltpu.CompilerParams(
            dimension_semantics=("parallel",),     # megacore sharding on v7x
            vmem_limit_bytes=int(vmem_limit),
        ),
        cost_estimate=cost,
    )(x_flat, w1, b1, w2, b2, w3, b3, w4, b4)

    z = z_pad[:B]
    x_hat = xhat_pad[:B].reshape(B, T, D)
    return z, x_hat


def init_params(key, input_dim, latent_dim, hidden=128, dtype=jnp.bfloat16):
    """PyTorch-style uniform(-1/sqrt(fan_in), 1/sqrt(fan_in)) init.

    Weights stored as (in_features, out_features).  Default dtype is bf16 so
    the MXU runs at full rate and w1/w4 HBM traffic / VMEM residency is halved;
    the kernel still accumulates in f32.  Pass dtype=jnp.float32 for bit-level
    parity with an f32 PyTorch reference.
    """
    def linear(key, fan_in, fan_out):
        kw, kb = jax.random.split(key)
        bound = 1.0 / jnp.sqrt(fan_in)
        w = jax.random.uniform(kw, (fan_in, fan_out), jnp.float32, -bound, bound)
        b = jax.random.uniform(kb, (1, fan_out), jnp.float32, -bound, bound)
        return w.astype(dtype), b.astype(dtype)

    k1, k2, k3, k4 = jax.random.split(key, 4)
    w1, b1 = linear(k1, input_dim, hidden)      # encoder Linear(input_dim, 128)
    w2, b2 = linear(k2, hidden, latent_dim)     # encoder Linear(128, latent_dim)
    w3, b3 = linear(k3, latent_dim, hidden)     # decoder Linear(latent_dim, 128)
    w4, b4 = linear(k4, hidden, input_dim)      # decoder Linear(128, input_dim)
    return (w1, b1, w2, b2, w3, b3, w4, b4)


def _reference_forward(x, params):
    """Pure-JAX reference mirroring the kernel math (same weight dtype)."""
    w1, b1, w2, b2, w3, b3, w4, b4 = params
    B, T, D = x.shape
    wd = w1.dtype
    f32 = jnp.float32
    x_flat = x.reshape(B, T * D).astype(wd)
    h1 = jnp.maximum(jnp.dot(x_flat, w1, preferred_element_type=f32)
                     + b1.astype(f32), 0.0)
    z = jnp.dot(h1.astype(wd), w2, preferred_element_type=f32) + b2.astype(f32)
    h2 = jnp.maximum(jnp.dot(z.astype(wd), w3, preferred_element_type=f32)
                     + b3.astype(f32), 0.0)
    x_hat = (jnp.dot(h2.astype(wd), w4, preferred_element_type=f32)
             + b4.astype(f32)).reshape(B, T, D)
    return z, x_hat


if __name__ == "__main__":
    # Small shapes: B=2, T=8, D=16 -> input_dim = T*D = 128, latent_dim = 32
    B, T, D = 2, 8, 16
    input_dim, latent_dim = T * D, 32

    key = jax.random.PRNGKey(0)
    kx, kp = jax.random.split(key)
    x = jax.random.normal(kx, (B, T, D), dtype=jnp.float32)
    params = init_params(kp, input_dim, latent_dim)   # bf16 weights by default

    z, x_hat = simple_ae_forward(x, params)
    jax.block_until_ready((z, x_hat))

    # Check against pure-JAX reference (same bf16 weights / same math).
    z_ref, x_hat_ref = _reference_forward(x, params)
    assert z.shape == (B, latent_dim)
    assert x_hat.shape == (B, T, D)
    assert jnp.allclose(z, z_ref, atol=2e-2, rtol=2e-2)
    assert jnp.allclose(x_hat, x_hat_ref, atol=2e-2, rtol=2e-2)

    print("KERNEL_OK")
</pallas_src>

<mosaic_0001>
module attributes {stable_mosaic.version = 11 : i64} {
  func.func @_ae_kernel(%arg0: i32, %arg1: memref<8x128xf32, #tpu.memory_space<vmem>>, %arg2: memref<128x128xbf16, #tpu.memory_space<vmem>>, %arg3: memref<1x128xbf16, #tpu.memory_space<vmem>>, %arg4: memref<128x32xbf16, #tpu.memory_space<vmem>>, %arg5: memref<1x32xbf16, #tpu.memory_space<vmem>>, %arg6: memref<32x128xbf16, #tpu.memory_space<vmem>>, %arg7: memref<1x128xbf16, #tpu.memory_space<vmem>>, %arg8: memref<128x128xbf16, #tpu.memory_space<vmem>>, %arg9: memref<1x128xbf16, #tpu.memory_space<vmem>>, %arg10: memref<8x32xf32, #tpu.memory_space<vmem>>, %arg11: memref<8x128xf32, #tpu.memory_space<vmem>>) attributes {dimension_semantics = [#tpu.dimension_semantics<parallel>], iteration_bounds = array<i64: 1>, scalar_prefetch = 0 : i64, scratch_operands = 0 : i64, tpu.core_type = #tpu.core_type<tc>, window_params = [{transform_indices = @transform_0, window_bounds = array<i64: 8, 128>}, {pipeline_mode = #tpu.pipeline_mode<synchronous>, transform_indices = @transform_1, window_bounds = array<i64: 128, 128>}, {pipeline_mode = #tpu.pipeline_mode<synchronous>, transform_indices = @transform_2, window_bounds = array<i64: 1, 128>}, {pipeline_mode = #tpu.pipeline_mode<synchronous>, transform_indices = @transform_3, window_bounds = array<i64: 128, 32>}, {pipeline_mode = #tpu.pipeline_mode<synchronous>, transform_indices = @transform_4, window_bounds = array<i64: 1, 32>}, {pipeline_mode = #tpu.pipeline_mode<synchronous>, transform_indices = @transform_5, window_bounds = array<i64: 32, 128>}, {pipeline_mode = #tpu.pipeline_mode<synchronous>, transform_indices = @transform_6, window_bounds = array<i64: 1, 128>}, {pipeline_mode = #tpu.pipeline_mode<synchronous>, transform_indices = @transform_7, window_bounds = array<i64: 128, 128>}, {pipeline_mode = #tpu.pipeline_mode<synchronous>, transform_indices = @transform_8, window_bounds = array<i64: 1, 128>}, {transform_indices = @transform_9, window_bounds = array<i64: 8, 32>}, {transform_indices = @transform_10, window_bounds = array<i64: 8, 128>}]} {
    %c0 = arith.constant 0 : index
    %c0_0 = arith.constant 0 : index
    %0 = vector.load %arg1[%c0, %c0_0] : memref<8x128xf32, #tpu.memory_space<vmem>>, vector<8x128xf32>
    %1 = arith.truncf %0 : vector<8x128xf32> to vector<8x128xbf16>
    %c0_1 = arith.constant 0 : index
    %c0_2 = arith.constant 0 : index
    %2 = vector.load %arg2[%c0_1, %c0_2] : memref<128x128xbf16, #tpu.memory_space<vmem>>, vector<128x128xbf16>
    %cst = arith.constant dense<0.000000e+00> : vector<8x128xf32>
    %3 = tpu.matmul %1, %2, %cst {dimension_numbers = #tpu.dot_dimension_numbers<[1], [0], [0], [1], [0, 0, 1, 1], [], []>} : vector<8x128xbf16>, vector<128x128xbf16>, vector<8x128xf32> -> vector<8x128xf32>
    %c0_3 = arith.constant 0 : index
    %c0_4 = arith.constant 0 : index
    %4 = vector.load %arg3[%c0_3, %c0_4] : memref<1x128xbf16, #tpu.memory_space<vmem>>, vector<1x128xbf16>
    %5 = arith.extf %4 : vector<1x128xbf16> to vector<1x128xf32>
    %6 = vector.broadcast %5 : vector<1x128xf32> to vector<8x128xf32>
    %7 = arith.addf %3, %6 : vector<8x128xf32>
    %cst_5 = arith.constant 0.000000e+00 : f32
    %8 = vector.broadcast %cst_5 : f32 to vector<8x128xf32>
    %9 = arith.maximumf %7, %8 : vector<8x128xf32>
    %10 = arith.truncf %9 : vector<8x128xf32> to vector<8x128xbf16>
    %c0_6 = arith.constant 0 : index
    %c0_7 = arith.constant 0 : index
    %11 = vector.load %arg4[%c0_6, %c0_7] : memref<128x32xbf16, #tpu.memory_space<vmem>>, vector<128x32xbf16>
    %cst_8 = arith.constant dense<0.000000e+00> : vector<8x32xf32>
    %12 = tpu.matmul %10, %11, %cst_8 {dimension_numbers = #tpu.dot_dimension_numbers<[1], [0], [0], [1], [0, 0, 1, 1], [], []>} : vector<8x128xbf16>, vector<128x32xbf16>, vector<8x32xf32> -> vector<8x32xf32>
    %c0_9 = arith.constant 0 : index
    %c0_10 = arith.constant 0 : index
    %13 = vector.load %arg5[%c0_9, %c0_10] : memref<1x32xbf16, #tpu.memory_space<vmem>>, vector<1x32xbf16>
    %14 = arith.extf %13 : vector<1x32xbf16> to vector<1x32xf32>
    %15 = vector.broadcast %14 : vector<1x32xf32> to vector<8x32xf32>
    %16 = arith.addf %12, %15 : vector<8x32xf32>
    %c0_11 = arith.constant 0 : index
    %c0_12 = arith.constant 0 : index
    %17 = vector.load %arg10[%c0_11, %c0_12] : memref<8x32xf32, #tpu.memory_space<vmem>>, vector<8x32xf32>
    tpu.vector_store %arg10[%c0_11, %c0_12], %16 {strides = array<i32>} : memref<8x32xf32, #tpu.memory_space<vmem>>, vector<8x32xf32>,
    %18 = arith.truncf %16 : vector<8x32xf32> to vector<8x32xbf16>
    %c0_13 = arith.constant 0 : index
    %c0_14 = arith.constant 0 : index
    %19 = vector.load %arg6[%c0_13, %c0_14] : memref<32x128xbf16, #tpu.memory_space<vmem>>, vector<32x128xbf16>
    %cst_15 = arith.constant dense<0.000000e+00> : vector<8x128xf32>
    %20 = tpu.matmul %18, %19, %cst_15 {dimension_numbers = #tpu.dot_dimension_numbers<[1], [0], [0], [1], [0, 0, 1, 1], [], []>} : vector<8x32xbf16>, vector<32x128xbf16>, vector<8x128xf32> -> vector<8x128xf32>
    %c0_16 = arith.constant 0 : index
    %c0_17 = arith.constant 0 : index
    %21 = vector.load %arg7[%c0_16, %c0_17] : memref<1x128xbf16, #tpu.memory_space<vmem>>, vector<1x128xbf16>
    %22 = arith.extf %21 : vector<1x128xbf16> to vector<1x128xf32>
    %23 = vector.broadcast %22 : vector<1x128xf32> to vector<8x128xf32>
    %24 = arith.addf %20, %23 : vector<8x128xf32>
    %cst_18 = arith.constant 0.000000e+00 : f32
    %25 = vector.broadcast %cst_18 : f32 to vector<8x128xf32>
    %26 = arith.maximumf %24, %25 : vector<8x128xf32>
    %27 = arith.truncf %26 : vector<8x128xf32> to vector<8x128xbf16>
    %c0_19 = arith.constant 0 : index
    %c0_20 = arith.constant 0 : index
    %28 = vector.load %arg8[%c0_19, %c0_20] : memref<128x128xbf16, #tpu.memory_space<vmem>>, vector<128x128xbf16>
    %cst_21 = arith.constant dense<0.000000e+00> : vector<8x128xf32>
    %29 = tpu.matmul %27, %28, %cst_21 {dimension_numbers = #tpu.dot_dimension_numbers<[1], [0], [0], [1], [0, 0, 1, 1], [], []>} : vector<8x128xbf16>, vector<128x128xbf16>, vector<8x128xf32> -> vector<8x128xf32>
    %c0_22 = arith.constant 0 : index
    %c0_23 = arith.constant 0 : index
    %30 = vector.load %arg9[%c0_22, %c0_23] : memref<1x128xbf16, #tpu.memory_space<vmem>>, vector<1x128xbf16>
    %31 = arith.extf %30 : vector<1x128xbf16> to vector<1x128xf32>
    %32 = vector.broadcast %31 : vector<1x128xf32> to vector<8x128xf32>
    %33 = arith.addf %29, %32 : vector<8x128xf32>
    %c0_24 = arith.constant 0 : index
    %c0_25 = arith.constant 0 : index
    %34 = vector.load %arg11[%c0_24, %c0_25] : memref<8x128xf32, #tpu.memory_space<vmem>>, vector<8x128xf32>
    tpu.vector_store %arg11[%c0_24, %c0_25], %33 {strides = array<i32>} : memref<8x128xf32, #tpu.memory_space<vmem>>, vector<8x128xf32>,
    return
  }
  func.func @transform_0(%arg0: i32) -> (i32, i32) {
    %c0_i32 = arith.constant 0 : i32
    %c0_i32_0 = arith.constant 0 : i32
    return %arg0, %c0_i32 : i32, i32
  }
  func.func @transform_1(%arg0: i32) -> (i32, i32) {
    %c0_i32 = arith.constant 0 : i32
    %c0_i32_0 = arith.constant 0 : i32
    %c0_i32_1 = arith.constant 0 : i32
    return %c0_i32, %c0_i32_0 : i32, i32
  }
  func.func @transform_2(%arg0: i32) -> (i32, i32) {
    %c0_i32 = arith.constant 0 : i32
    %c0_i32_0 = arith.constant 0 : i32
    %c0_i32_1 = arith.constant 0 : i32
    return %c0_i32, %c0_i32_0 : i32, i32
  }
  func.func @transform_3(%arg0: i32) -> (i32, i32) {
    %c0_i32 = arith.constant 0 : i32
    %c0_i32_0 = arith.constant 0 : i32
    %c0_i32_1 = arith.constant 0 : i32
    return %c0_i32, %c0_i32_0 : i32, i32
  }
  func.func @transform_4(%arg0: i32) -> (i32, i32) {
    %c0_i32 = arith.constant 0 : i32
    %c0_i32_0 = arith.constant 0 : i32
    %c0_i32_1 = arith.constant 0 : i32
    return %c0_i32, %c0_i32_0 : i32, i32
  }
  func.func @transform_5(%arg0: i32) -> (i32, i32) {
    %c0_i32 = arith.constant 0 : i32
    %c0_i32_0 = arith.constant 0 : i32
    %c0_i32_1 = arith.constant 0 : i32
    return %c0_i32, %c0_i32_0 : i32, i32
  }
  func.func @transform_6(%arg0: i32) -> (i32, i32) {
    %c0_i32 = arith.constant 0 : i32
    %c0_i32_0 = arith.constant 0 : i32
    %c0_i32_1 = arith.constant 0 : i32
    return %c0_i32, %c0_i32_0 : i32, i32
  }
  func.func @transform_7(%arg0: i32) -> (i32, i32) {
    %c0_i32 = arith.constant 0 : i32
    %c0_i32_0 = arith.constant 0 : i32
    %c0_i32_1 = arith.constant 0 : i32
    return %c0_i32, %c0_i32_0 : i32, i32
  }
  func.func @transform_8(%arg0: i32) -> (i32, i32) {
    %c0_i32 = arith.constant 0 : i32
    %c0_i32_0 = arith.constant 0 : i32
    %c0_i32_1 = arith.constant 0 : i32
    return %c0_i32, %c0_i32_0 : i32, i32
  }
  func.func @transform_9(%arg0: i32) -> (i32, i32) {
    %c0_i32 = arith.constant 0 : i32
    %c0_i32_0 = arith.constant 0 : i32
    return %arg0, %c0_i32 : i32, i32
  }
  func.func @transform_10(%arg0: i32) -> (i32, i32) {
    %c0_i32 = arith.constant 0 : i32
    %c0_i32_0 = arith.constant 0 : i32
    return %arg0, %c0_i32 : i32, i32
  }
}

</mosaic_0001>

<bundles_post_ra>
// kernel: simple_ae_forward.1
= control target key start
LH: loop header
LB: loop body
LE: loop exit
PB: predicated region body
PF: predicated region fallthrough
CT: control target
= control target key end

     0   :  { %16 = vsyncpa [#allocation3], 0  ;;  %s505_s16 = smov [#allocation2]   ;;  %s506_s18 = smov 64   ;;  %s641_s0 = inlined_call_operand.vmem [shape: f32[8,128], index: 0, kind: input, shape index: {}]   ;;  %s642_s1 = inlined_call_operand.vmem [shape: bf16[128,128], index: 1, kind: input, shape index: {}]   ;;  %s643_s2 = inlined_call_operand.vmem [shape: bf16[1,128], index: 2, kind: input, shape index: {}]   ;;  %s644_s3 = inlined_call_operand.vmem [shape: bf16[128,32], index: 3, kind: input, shape index: {}]   ;;  %s645_s4 = inlined_call_operand.vmem [shape: bf16[1,32], index: 4, kind: input, shape index: {}]   ;;  %s646_s5 = inlined_call_operand.vmem [shape: bf16[32,128], index: 5, kind: input, shape index: {}]   ;;  %s647_s6 = inlined_call_operand.vmem [shape: bf16[1,128], index: 6, kind: input, shape index: {}]   ;;  %s648_s7 = inlined_call_operand.hbm [shape: bf16[128,128], index: 7, kind: input, shape index: {}]   ;;  %s649_s8 = inlined_call_operand.vmem [shape: bf16[1,128], index: 8, kind: input, shape index: {}]   ;;  %s650_s9 = inlined_call_operand.vmem [shape: f32[8,32], index: 9, kind: output, shape index: {0}]   ;;  %s651_s10 = inlined_call_operand.vmem [shape: f32[8,128], index: 10, kind: output, shape index: {1}]  }
   0x1   :  { %s35_s15 = sshll.u32 %s648_s7, 4  ;;  %s37_s17 = sshll.u32 %s505_s16, 4  ;;  %s36_s15 = int_to_ptr.hbm [resolvable:$true] %s35_s15  ;;  %s38_s17 = int_to_ptr.vmem [resolvable:$true] %s37_s17 }
   0x2   :  { %s507_s19 = smov 4  }
   0x3   :  { %43 = dma.hbm_to_vmem [thread:$0]  %s36_s15, 1024, %s38_s17, [#allocation3], %s506_s18, %s506_s18, %s507_s19  }
   0x4   :  { %503 = dma.done.wait [#allocation3], 1024  }
   0x5   :  { %504 = vsyncadd [#allocation3], 4294966272  ;;  %v457_v0 = vld [vmem:[%s642_s1 + $0x38] sm:$0xff]  ;;  %v456_v1 = vld [vmem:[%s642_s1 + $0x30] sm:$0xff]  ;;  %vm215_vm0 = vcmask 261120  }
   0x6   :  { %120 = vmatpush.bf16.msra.mxu0 %v457_v0  ;;  %v465_v2 = vld [vmem:[%s644_s3 + $0x38] sm:$0xff]  ;;  %v464_v3 = vld [vmem:[%s644_s3 + $0x30] sm:$0xff]  ;;  %v455_v4 = vld [vmem:[%s642_s1 + $0x28] sm:$0xff] }
   0x7   :  { %202 = vmatpush.bf16.msra.mxu1 %v465_v2  ;;  %v463_v5 = vld [vmem:[%s644_s3 + $0x28] sm:$0xff]  ;;  %v454_v6 = vld [vmem:[%s642_s1 + $0x20] sm:$0xff]  ;;  %v453_v8 = vld [vmem:[%s642_s1 + $0x18] sm:$0xff] }
   0x8   :  { %v462_v7 = vld [vmem:[%s644_s3 + $0x20] sm:$0xff]  ;;  %v461_v9 = vld [vmem:[%s644_s3 + $0x18] sm:$0xff]  ;;  %v452_v10 = vld [vmem:[%s642_s1 + $0x10] sm:$0xff] }
   0x9   :  { %v460_v11 = vld [vmem:[%s644_s3 + $0x10] sm:$0xff]  ;;  %v451_v12 = vld [vmem:[%s642_s1 + $0x8] sm:$0xff]  ;;  %v450_v13 = vld [vmem:[%s642_s1] sm:$0xff] }
   0xa   :  { %121 = vmatpush.bf16.msra.mxu0 %v456_v1  ;;  %v51_v14 = vld [vmem:[%s641_s0] sm:$0xff]  ;;  %v459_v16 = vld [vmem:[%s644_s3 + $0x8] sm:$0xff]  ;;  %v475_v28 = vld [vmem:[#allocation2 + $0x38] sm:$0xff] }
   0xb   :  { %203 = vmatpush.bf16.msra.mxu1 %v464_v3  ;;  %v52_v15 = vpack.c.bf16 %v51_v14, %v51_v14  ;;  %v458_v17 = vld [vmem:[%s644_s3] sm:$0xff]  ;;  %v467_v18 = vld [vmem:[%s646_s5 + $0x8] sm:$0xff]  ;;  %322 = vmatpush.bf16.msra.mxu3 %v475_v28  ;;  %v474_v29 = vld [vmem:[#allocation2 + $0x30] sm:$0xff] }
   0xc   :  { %246 = vmatpush.bf16.msra.mxu2 %v467_v18  ;;  %v69_v19 = vld [vmem:[%s643_s2] sm:$0x1]  ;;  %v473_v30 = vld [vmem:[#allocation2 + $0x28] sm:$0xff]  ;;  %v471_v33 = vld [vmem:[#allocation2 + $0x18] sm:$0xff] }
   0xd   :  { %v70_v20 = vunpack.c.l.bf16 %v69_v19  ;;  %v466_v27 = vld [vmem:[%s646_s5] sm:$0xff]  ;;  %v470_v35 = vld [vmem:[#allocation2 + $0x10] sm:$0xff]  ;;  %v469_v41 = vld [vmem:[#allocation2 + $0x8] sm:$0xff] }
   0xe   :  { %122 = vmatpush.bf16.msra.mxu0 %v455_v4  ;;  %v472_v31 = vld [vmem:[#allocation2 + $0x20] sm:$0xff] }
   0xf   :  { %204 = vmatpush.bf16.msra.mxu1 %v463_v5  ;;  %v71_v21 = vperm.slane %v70_v20, 0  ;;  %323 = vmatpush.bf16.msra.mxu3 %v474_v29  ;;  %v151_v32 = vld [vmem:[%s645_s4] sm:$0x1] }
  0x10   :  { %247 = vmatpush.bf16.msra.mxu2 %v466_v27  ;;  %v152_v34 = vunpack.c.l.bf16 %v151_v32  ;;  %v468_v42 = vld [vmem:[#allocation2] sm:$0xff] }
  0x11   :  { %v222_v43 = vld [vmem:[%s647_s6] sm:$0x1] }
  0x12   :  { %123 = vmatpush.bf16.msra.mxu0 %v454_v6  ;;  %v153_v36 = vperm.slane %v152_v34, 0  ;;  %v223_v44 = vunpack.c.l.bf16 %v222_v43  ;;  %v271_v51 = vld [vmem:[%s649_s8] sm:$0x1] }
  0x13   :  { %205 = vmatpush.bf16.msra.mxu1 %v462_v7  ;;  %324 = vmatpush.bf16.msra.mxu3 %v473_v30  ;;  %v272_v52 = vunpack.c.l.bf16 %v271_v51 }
  0x14   :  { %v224_v45 = vperm.slane %v223_v44, 0 }
  0x15   :  { %v273_v53 = vperm.slane %v272_v52, 0 }
  0x16   :  { %124 = vmatpush.bf16.msra.mxu0 %v453_v8 }
  0x17   :  { %206 = vmatpush.bf16.msra.mxu1 %v461_v9  ;;  %325 = vmatpush.bf16.msra.mxu3 %v472_v31 }
  0x1a   :  { %125 = vmatpush.bf16.msra.mxu0 %v452_v10 }
  0x1b   :  { %207 = vmatpush.bf16.msra.mxu1 %v460_v11  ;;  %326 = vmatpush.bf16.msra.mxu3 %v471_v33 }
  0x1e   :  { %126 = vmatpush.bf16.msra.mxu0 %v451_v12 }
  0x1f   :  { %208 = vmatpush.bf16.msra.mxu1 %v459_v16  ;;  %327 = vmatpush.bf16.msra.mxu3 %v470_v35 }
  0x22   :  { %127 = vmatpush.bf16.msra.mxu0 %v450_v13 }
  0x23   :  { %209 = vmatpush.bf16.msra.mxu1 %v458_v17  ;;  %328 = vmatpush.bf16.msra.mxu3 %v469_v41 }
  0x25   :  { %128 = vmatmul.bf16.vlgmr.msra.gmra.mxu0 %v52_v15 }
  0x27   :  { %329 = vmatpush.bf16.msra.mxu3 %v468_v42 }
  0xa2   :  { %v129_v22 = vpop.f32.mrf.mxu0 }
  0xa3   :  { %v130_v23 = vadd.f32 %v129_v22, %v71_v21 }
  0xa5   :  { %v133_v24 = vmax.f32 %v130_v23, 0.0 }
  0xa7   :  { %v134_v25 = vpack.c.bf16 %v133_v24, %v133_v24 }
  0xa9   :  { %210 = vmatmul.bf16.vlgmr.msra.gmra.mxu1 %v134_v25 }
  0xaa   :  { %v131_v26 = vpop.f32.mrf.mxu0 }
 0x126   :  { %v211_v37 = vpop.f32.mrf.mxu1 }
 0x127   :  { %v212_v38 = vadd.f32 %v211_v37, %v153_v36 }
 0x129   :  { %v217_v39 = vpack.c.bf16 %v212_v38, %v212_v38  ;;  %216 = vst.msk [vmem:[%s650_s9] sm:$0xff] %vm215_vm0, %v212_v38 }
 0x12b   :  { %417 = vmatmul.msk.bf16.vlgmr.msra.gmra.mxu2 %vm215_vm0, %v217_v39 }
 0x12e   :  { %v213_v40 = vpop.f32.mrf.mxu1 }
 0x1ae   :  { %v249_v46 = vpop.f32.mrf.mxu2 }
 0x1af   :  { %v250_v47 = vadd.f32 %v249_v46, %v224_v45 }
 0x1b1   :  { %v253_v48 = vmax.f32 %v250_v47, 0.0 }
 0x1b3   :  { %v254_v49 = vpack.c.bf16 %v253_v48, %v253_v48 }
 0x1b5   :  { %330 = vmatmul.bf16.vlgmr.msra.gmra.mxu3 %v254_v49 }
 0x1b6   :  { %v251_v50 = vpop.f32.mrf.mxu2 }
 0x238   :  { %v331_v54 = vpop.f32.mrf.mxu3 }
 0x239   :  { %v332_v55 = vadd.f32 %v331_v54, %v273_v53 }
 0x23b   :  { %335 = vst [vmem:[%s651_s10] sm:$0xff] %v332_v55 }
 0x240   :  { %v333_v56 = vpop.f32.mrf.mxu3 }
 0x241   :  { %344 = vsyncpa [#allocation3], 1 }

</bundles_post_ra>
